<compile_context>
chip_gen: v5e
topology: v5e:2x2
jax: 0.10.0
libtpu: 0.0.40
codegen_flags: <defaults>
</compile_context>

<pallas_src>
import functools
import math

import jax
import jax.numpy as jnp
from jax.experimental import pallas as pl
from jax.experimental.pallas import tpu as pltpu

GELU_CONST = math.sqrt(2.0 / math.pi)


def _round_up(x, m):
    return ((x + m - 1) // m) * m


def _pad2d(a, rows, cols):
    r, c = a.shape
    if r == rows and c == cols:
        return a
    return jnp.pad(a, ((0, rows - r), (0, cols - c)))


def ffn_kernel(x_ref, w1_ref, b1_ref, w2_ref, b2_ref, o_ref, acc_ref):
    # x_ref:  (TM, d_model_p)       token tile (constant across the d_ff axis)
    # w1_ref: (d_model_p, TFF)      d_ff slice of the first linear weight
    # b1_ref: (1, TFF)
    # w2_ref: (TFF, d_model_p)      d_ff slice of the second linear weight
    # b2_ref: (1, d_model_p)        resident
    # o_ref:  (TM, d_model_p)
    # acc_ref:(TM, d_model_p) f32   accumulator over the d_ff axis
    j = pl.program_id(1)

    @pl.when(j == 0)
    def _():
        # Seed the accumulator with the second bias so it is added exactly once.
        acc_ref[...] = jnp.broadcast_to(
            b2_ref[...].astype(jnp.float32), acc_ref.shape)

    # Linear 1 (this d_ff slice) on the MXU: native-dtype operands, f32 accum.
    h = jnp.dot(x_ref[...], w1_ref[...], preferred_element_type=jnp.float32)
    h = h + b1_ref[...].astype(jnp.float32)

    # tanh-approx GELU in f32 (tanh goes to the EUP, hidden under the MXU).
    h = 0.5 * h * (1.0 + jnp.tanh(GELU_CONST * h * (1.0 + 0.044715 * h * h)))

    # Linear 2 partial product on the MXU; cast intermediate back to the weight
    # dtype so a bf16 deployment runs at full MXU rate; accumulation stays f32.
    acc_ref[...] += jnp.dot(h.astype(w2_ref.dtype), w2_ref[...],
                            preferred_element_type=jnp.float32)

    @pl.when(j == pl.num_programs(1) - 1)
    def _():
        # TODO(synk): dropout is identity here (eval mode); train-mode dropout
        # would use pltpu.prng_seed / pltpu.stateful_bernoulli.
        o_ref[...] = acc_ref[...].astype(o_ref.dtype)


@functools.partial(jax.jit, static_argnames=("block_tokens", "block_ff"))
def positionwise_feed_forward(x, w1, b1, w2, b2, *, block_tokens=256,
                              block_ff=None):
    """x: (batch, seq, d_model); w1: (d_model, d_ff); w2: (d_ff, d_model)."""
    batch, seq, d_model = x.shape
    d_ff = w1.shape[1]
    tokens = batch * seq

    w_itemsize = jnp.dtype(w1.dtype).itemsize
    x_itemsize = jnp.dtype(x.dtype).itemsize

    # --- Tiling --------------------------------------------------------------
    # Features padded to 128-lane multiples -> unmasked, lane-dense stores.
    dm_p = _round_up(d_model, 128)
    dff_p = _round_up(d_ff, 128)

    # Token tile: multiple of 8 sublanes, capped by the (padded) token count.
    tm = _round_up(min(block_tokens, _round_up(tokens, 8)), 8)
    tokens_p = _round_up(tokens, tm)

    # d_ff tile: keep both weight matrices fully resident in VMEM when they fit
    # a conservative budget (safe under v7x's 64 MiB VMEM even with the
    # pipeline's double buffering); otherwise stream d_ff tiles and accumulate.
    budget = 20 << 20
    if block_ff is not None:
        tff = max(128, _round_up(min(block_ff, dff_p), 128))
    elif 2 * dm_p * dff_p * w_itemsize <= budget:
        tff = dff_p                                  # weights fully resident
    else:
        tff = dff_p
        while tff > 128 and 2 * (2 * dm_p * tff * w_itemsize) > budget:
            tff = _round_up(tff // 2, 128)
    dff_p = _round_up(dff_p, tff)                    # make tff divide padded d_ff

    # --- Zero-padded operands (padding provably contributes nothing) ---------
    x2d = _pad2d(x.reshape(tokens, d_model), tokens_p, dm_p)
    w1_p = _pad2d(w1, dm_p, dff_p)
    b1_p = _pad2d(b1.reshape(1, d_ff), 1, dff_p)
    w2_p = _pad2d(w2, dff_p, dm_p)
    b2_p = _pad2d(b2.reshape(1, d_model), 1, dm_p)

    grid = (tokens_p // tm, dff_p // tff)

    # --- Scheduling hints -----------------------------------------------------
    vmem_est = (
        2 * (dm_p * tff + tff * dm_p) * w_itemsize    # double-buffered weights
        + 2 * (tff + dm_p) * w_itemsize               # biases
        + 2 * 2 * tm * dm_p * x_itemsize              # x / out tiles
        + tm * dm_p * 4                               # f32 accumulator
        + tm * tff * 4                                # f32 intermediate h
    )
    vmem_limit = int(min(64 << 20, max(32 << 20, int(vmem_est * 1.5))))

    cost = pl.CostEstimate(
        flops=4 * tokens_p * dm_p * dff_p,
        transcendentals=tokens_p * dff_p,
        bytes_accessed=(
            2 * tokens_p * dm_p * x_itemsize          # x in + y out
            + 2 * dm_p * dff_p * w_itemsize           # w1 + w2
            + (dff_p + dm_p) * w_itemsize             # biases
        ),
    )

    out = pl.pallas_call(
        ffn_kernel,
        out_shape=jax.ShapeDtypeStruct((tokens_p, dm_p), x.dtype),
        grid=grid,
        in_specs=[
            pl.BlockSpec((tm, dm_p), lambda i, j: (i, 0)),     # x: token tiled
            pl.BlockSpec((dm_p, tff), lambda i, j: (0, j)),    # w1: d_ff tiled
            pl.BlockSpec((1, tff), lambda i, j: (0, j)),       # b1: d_ff tiled
            pl.BlockSpec((tff, dm_p), lambda i, j: (j, 0)),    # w2: d_ff tiled
            pl.BlockSpec((1, dm_p), lambda i, j: (0, 0)),      # b2: resident
        ],
        out_specs=pl.BlockSpec((tm, dm_p), lambda i, j: (i, 0)),
        scratch_shapes=[pltpu.VMEM((tm, dm_p), jnp.float32)],
        compiler_params=pltpu.CompilerParams(
            dimension_semantics=("parallel", "arbitrary"),
            vmem_limit_bytes=vmem_limit,
        ),
        cost_estimate=cost,
    )(x2d, w1_p, b1_p, w2_p, b2_p)

    return out[:tokens, :d_model].reshape(batch, seq, d_model)


def init_linear_params(key, in_features, out_features, dtype=jnp.float32):
    """Mimic nn.Linear default init: U(-1/sqrt(fan_in), 1/sqrt(fan_in))."""
    kw, kb = jax.random.split(key)
    bound = 1.0 / math.sqrt(in_features)
    # stored pre-transposed: (in_features, out_features)
    w = jax.random.uniform(kw, (in_features, out_features), dtype, -bound, bound)
    b = jax.random.uniform(kb, (out_features,), dtype, -bound, bound)
    return w, b


def reference_ffn(x, w1, b1, w2, b2):
    h = x @ w1 + b1
    h = 0.5 * h * (1.0 + jnp.tanh(GELU_CONST * (h + 0.044715 * h ** 3)))
    return h @ w2 + b2


if __name__ == "__main__":
    key = jax.random.PRNGKey(0)

    # --- Config 1: small FFN (single resident-weight d_ff tile) -------------
    batch, seq, d_model, d_ff = 2, 8, 32, 64
    kx, k1, k2, key = jax.random.split(key, 4)
    x = jax.random.normal(kx, (batch, seq, d_model), jnp.float32)
    w1, b1 = init_linear_params(k1, d_model, d_ff)
    w2, b2 = init_linear_params(k2, d_ff, d_model)
    y_ref = reference_ffn(x, w1, b1, w2, b2)

    y = jax.block_until_ready(positionwise_feed_forward(x, w1, b1, w2, b2))
    assert y.shape == (batch, seq, d_model)
    assert jnp.allclose(y, y_ref, atol=1e-4, rtol=1e-4)

    # Multi-token-tile path: exercises the token grid loop, resident weights,
    # and the padded-tail handling.
    y_tiled = jax.block_until_ready(
        positionwise_feed_forward(x, w1, b1, w2, b2, block_tokens=8))
    assert jnp.allclose(y_tiled, y_ref, atol=1e-4, rtol=1e-4)

    # --- Config 2: forced d_ff streaming (2 reduction steps + accumulator) --
    d_ff2 = 256
    kxb, k1b, k2b, key = jax.random.split(key, 4)
    x2 = jax.random.normal(kxb, (batch, seq, d_model), jnp.float32)
    w1b, b1b = init_linear_params(k1b, d_model, d_ff2)
    w2b, b2b = init_linear_params(k2b, d_ff2, d_model)
    y2_ref = reference_ffn(x2, w1b, b1b, w2b, b2b)
    y2 = jax.block_until_ready(
        positionwise_feed_forward(x2, w1b, b1b, w2b, b2b, block_ff=128))
    assert jnp.allclose(y2, y2_ref, atol=1e-4, rtol=1e-4)

    print("KERNEL_OK")
</pallas_src>

<mosaic_0001>
module attributes {stable_mosaic.version = 11 : i64} {
  func.func @ffn_kernel(%arg0: i32, %arg1: i32, %arg2: memref<16x128xf32, #tpu.memory_space<vmem>>, %arg3: memref<128x128xf32, #tpu.memory_space<vmem>>, %arg4: memref<1x128xf32, #tpu.memory_space<vmem>>, %arg5: memref<128x128xf32, #tpu.memory_space<vmem>>, %arg6: memref<1x128xf32, #tpu.memory_space<vmem>>, %arg7: memref<16x128xf32, #tpu.memory_space<vmem>>, %arg8: memref<16x128xf32, #tpu.memory_space<vmem>>) attributes {dimension_semantics = [#tpu.dimension_semantics<parallel>, #tpu.dimension_semantics<arbitrary>], iteration_bounds = array<i64: 1, 1>, scalar_prefetch = 0 : i64, scratch_operands = 1 : i64, tpu.core_type = #tpu.core_type<tc>, window_params = [{transform_indices = @transform_0, window_bounds = array<i64: 16, 128>}, {transform_indices = @transform_1, window_bounds = array<i64: 128, 128>}, {transform_indices = @transform_2, window_bounds = array<i64: 1, 128>}, {transform_indices = @transform_3, window_bounds = array<i64: 128, 128>}, {pipeline_mode = #tpu.pipeline_mode<synchronous>, transform_indices = @transform_4, window_bounds = array<i64: 1, 128>}, {transform_indices = @transform_5, window_bounds = array<i64: 16, 128>}]} {
    %c0_i32 = arith.constant 0 : i32
    %0 = arith.cmpi eq, %arg1, %c0_i32 : i32
    %1 = arith.extui %0 : i1 to i32
    %c0_i32_0 = arith.constant 0 : i32
    %2 = arith.cmpi ne, %1, %c0_i32_0 : i32
    scf.if %2 {
      %c0_20 = arith.constant 0 : index
      %c0_21 = arith.constant 0 : index
      %31 = vector.load %arg6[%c0_20, %c0_21] : memref<1x128xf32, #tpu.memory_space<vmem>>, vector<1x128xf32>
      %32 = vector.shape_cast %31 : vector<1x128xf32> to vector<1x128xf32>
      %33 = vector.broadcast %32 : vector<1x128xf32> to vector<16x128xf32>
      %c0_22 = arith.constant 0 : index
      %c0_23 = arith.constant 0 : index
      %34 = vector.load %arg8[%c0_22, %c0_23] : memref<16x128xf32, #tpu.memory_space<vmem>>, vector<16x128xf32>
      tpu.vector_store %arg8[%c0_22, %c0_23], %33 {strides = array<i32>} : memref<16x128xf32, #tpu.memory_space<vmem>>, vector<16x128xf32>,
    } else {
    }
    %c0 = arith.constant 0 : index
    %c0_1 = arith.constant 0 : index
    %3 = vector.load %arg2[%c0, %c0_1] : memref<16x128xf32, #tpu.memory_space<vmem>>, vector<16x128xf32>
    %c0_2 = arith.constant 0 : index
    %c0_3 = arith.constant 0 : index
    %4 = vector.load %arg3[%c0_2, %c0_3] : memref<128x128xf32, #tpu.memory_space<vmem>>, vector<128x128xf32>
    %cst = arith.constant dense<0.000000e+00> : vector<16x128xf32>
    %5 = tpu.matmul %3, %4, %cst {dimension_numbers = #tpu.dot_dimension_numbers<[1], [0], [0], [1], [0, 0, 1, 1], [], []>} : vector<16x128xf32>, vector<128x128xf32>, vector<16x128xf32> -> vector<16x128xf32>
    %c0_4 = arith.constant 0 : index
    %c0_5 = arith.constant 0 : index
    %6 = vector.load %arg4[%c0_4, %c0_5] : memref<1x128xf32, #tpu.memory_space<vmem>>, vector<1x128xf32>
    %7 = vector.broadcast %6 : vector<1x128xf32> to vector<16x128xf32>
    %8 = arith.addf %5, %7 : vector<16x128xf32>
    %cst_6 = arith.constant 5.000000e-01 : f32
    %9 = vector.broadcast %cst_6 : f32 to vector<16x128xf32>
    %10 = arith.mulf %9, %8 : vector<16x128xf32>
    %cst_7 = arith.constant 0.797884583 : f32
    %11 = vector.broadcast %cst_7 : f32 to vector<16x128xf32>
    %12 = arith.mulf %11, %8 : vector<16x128xf32>
    %cst_8 = arith.constant 4.471500e-02 : f32
    %13 = vector.broadcast %cst_8 : f32 to vector<16x128xf32>
    %14 = arith.mulf %13, %8 : vector<16x128xf32>
    %15 = arith.mulf %14, %8 : vector<16x128xf32>
    %cst_9 = arith.constant 1.000000e+00 : f32
    %16 = vector.broadcast %cst_9 : f32 to vector<16x128xf32>
    %17 = arith.addf %16, %15 : vector<16x128xf32>
    %18 = arith.mulf %12, %17 : vector<16x128xf32>
    %19 = math.tanh %18 : vector<16x128xf32>
    %cst_10 = arith.constant 1.000000e+00 : f32
    %20 = vector.broadcast %cst_10 : f32 to vector<16x128xf32>
    %21 = arith.addf %20, %19 : vector<16x128xf32>
    %22 = arith.mulf %10, %21 : vector<16x128xf32>
    %c0_11 = arith.constant 0 : index
    %c0_12 = arith.constant 0 : index
    %23 = vector.load %arg8[%c0_11, %c0_12] : memref<16x128xf32, #tpu.memory_space<vmem>>, vector<16x128xf32>
    %c0_13 = arith.constant 0 : index
    %c0_14 = arith.constant 0 : index
    %24 = vector.load %arg5[%c0_13, %c0_14] : memref<128x128xf32, #tpu.memory_space<vmem>>, vector<128x128xf32>
    %cst_15 = arith.constant dense<0.000000e+00> : vector<16x128xf32>
    %25 = tpu.matmul %22, %24, %cst_15 {dimension_numbers = #tpu.dot_dimension_numbers<[1], [0], [0], [1], [0, 0, 1, 1], [], []>} : vector<16x128xf32>, vector<128x128xf32>, vector<16x128xf32> -> vector<16x128xf32>
    %26 = arith.addf %23, %25 : vector<16x128xf32>
    %c0_16 = arith.constant 0 : index
    %c0_17 = arith.constant 0 : index
    %27 = vector.load %arg8[%c0_16, %c0_17] : memref<16x128xf32, #tpu.memory_space<vmem>>, vector<16x128xf32>
    tpu.vector_store %arg8[%c0_16, %c0_17], %26 {strides = array<i32>} : memref<16x128xf32, #tpu.memory_space<vmem>>, vector<16x128xf32>,
    %c0_i32_18 = arith.constant 0 : i32
    %28 = arith.cmpi eq, %arg1, %c0_i32_18 : i32
    %29 = arith.extui %28 : i1 to i32
    %c0_i32_19 = arith.constant 0 : i32
    %30 = arith.cmpi ne, %29, %c0_i32_19 : i32
    scf.if %30 {
      %c0_20 = arith.constant 0 : index
      %c0_21 = arith.constant 0 : index
      %31 = vector.load %arg8[%c0_20, %c0_21] : memref<16x128xf32, #tpu.memory_space<vmem>>, vector<16x128xf32>
      %c0_22 = arith.constant 0 : index
      %c0_23 = arith.constant 0 : index
      %32 = vector.load %arg7[%c0_22, %c0_23] : memref<16x128xf32, #tpu.memory_space<vmem>>, vector<16x128xf32>
      tpu.vector_store %arg7[%c0_22, %c0_23], %31 {strides = array<i32>} : memref<16x128xf32, #tpu.memory_space<vmem>>, vector<16x128xf32>,
    } else {
    }
    return
  }
  func.func @transform_0(%arg0: i32, %arg1: i32) -> (i32, i32) {
    %c0_i32 = arith.constant 0 : i32
    %c0_i32_0 = arith.constant 0 : i32
    return %arg0, %c0_i32 : i32, i32
  }
  func.func @transform_1(%arg0: i32, %arg1: i32) -> (i32, i32) {
    %c0_i32 = arith.constant 0 : i32
    %c0_i32_0 = arith.constant 0 : i32
    return %c0_i32, %arg1 : i32, i32
  }
  func.func @transform_2(%arg0: i32, %arg1: i32) -> (i32, i32) {
    %c0_i32 = arith.constant 0 : i32
    %c0_i32_0 = arith.constant 0 : i32
    return %c0_i32, %arg1 : i32, i32
  }
  func.func @transform_3(%arg0: i32, %arg1: i32) -> (i32, i32) {
    %c0_i32 = arith.constant 0 : i32
    %c0_i32_0 = arith.constant 0 : i32
    return %arg1, %c0_i32 : i32, i32
  }
  func.func @transform_4(%arg0: i32, %arg1: i32) -> (i32, i32) {
    %c0_i32 = arith.constant 0 : i32
    %c0_i32_0 = arith.constant 0 : i32
    %c0_i32_1 = arith.constant 0 : i32
    return %c0_i32, %c0_i32_0 : i32, i32
  }
  func.func @transform_5(%arg0: i32, %arg1: i32) -> (i32, i32) {
    %c0_i32 = arith.constant 0 : i32
    %c0_i32_0 = arith.constant 0 : i32
    return %arg0, %c0_i32 : i32, i32
  }
}

</mosaic_0001>

<bundles_post_ra>
// kernel: positionwise_feed_forward.1
= control target key start
LH: loop header
LB: loop body
LE: loop exit
PB: predicated region body
PF: predicated region fallthrough
CT: control target
= control target key end

     0   :  { %s331_s1 = inlined_call_operand.vmem [shape: f32[128,128], index: 1, kind: input, shape index: {}]   ;;  %s332_s3 = inlined_call_operand.vmem [shape: f32[128,128], index: 3, kind: input, shape index: {}]   ;;  %s333_s2 = inlined_call_operand.vmem [shape: f32[1,128], index: 2, kind: input, shape index: {}]   ;;  %s334_s0 = inlined_call_operand.vmem [shape: f32[16,128], index: 0, kind: input, shape index: {}]   ;;  %s335_s4 = inlined_call_operand.vmem [shape: f32[1,128], index: 4, kind: input, shape index: {}]   ;;  %s336_s5 = inlined_call_operand.vmem [shape: f32[16,128], index: 5, kind: output, shape index: {}]  }
   0x1   :  { %v47_v0 = vld [vmem:[%s331_s1 + $0x78] sm:$0xff]  ;;  %v46_v1 = vld [vmem:[%s331_s1 + $0x70] sm:$0xff]  ;;  %v45_v2 = vld [vmem:[%s331_s1 + $0x68] sm:$0xff] }
   0x2   :  { %52 = vmatpush.msra.mxu0 %v47_v0  ;;  %149 = vmatpush.msra.mxu2 %v47_v0  ;;  %v44_v3 = vld [vmem:[%s331_s1 + $0x60] sm:$0xff]  ;;  %v43_v4 = vld [vmem:[%s331_s1 + $0x58] sm:$0xff]  ;;  %v109_v6 = vld [vmem:[%s332_s3 + $0x70] sm:$0xff] }
   0x3   :  { %v110_v5 = vld [vmem:[%s332_s3 + $0x78] sm:$0xff]  ;;  %v42_v7 = vld [vmem:[%s331_s1 + $0x50] sm:$0xff]  ;;  %v108_v8 = vld [vmem:[%s332_s3 + $0x68] sm:$0xff] }
   0x4   :  { %53 = vmatpush.msra.mxu0 %v46_v1  ;;  %150 = vmatpush.msra.mxu2 %v46_v1  ;;  %v41_v9 = vld [vmem:[%s331_s1 + $0x48] sm:$0xff]  ;;  %v107_v10 = vld [vmem:[%s332_s3 + $0x60] sm:$0xff]  ;;  %v106_v12 = vld [vmem:[%s332_s3 + $0x58] sm:$0xff] }
   0x5   :  { %111 = vmatpush.msra.mxu1 %v110_v5  ;;  %165 = vmatpush.msra.mxu3 %v110_v5  ;;  %v40_v11 = vld [vmem:[%s331_s1 + $0x40] sm:$0xff]  ;;  %v39_v13 = vld [vmem:[%s331_s1 + $0x38] sm:$0xff]  ;;  %v38_v14 = vld [vmem:[%s331_s1 + $0x30] sm:$0xff] }
   0x6   :  { %54 = vmatpush.msra.mxu0 %v45_v2  ;;  %151 = vmatpush.msra.mxu2 %v45_v2  ;;  %v37_v15 = vld [vmem:[%s331_s1 + $0x28] sm:$0xff]  ;;  %v36_v16 = vld [vmem:[%s331_s1 + $0x20] sm:$0xff]  ;;  %v35_v17 = vld [vmem:[%s331_s1 + $0x18] sm:$0xff] }
   0x7   :  { %112 = vmatpush.msra.mxu1 %v109_v6  ;;  %166 = vmatpush.msra.mxu3 %v109_v6  ;;  %v34_v18 = vld [vmem:[%s331_s1 + $0x10] sm:$0xff]  ;;  %v33_v19 = vld [vmem:[%s331_s1 + $0x8] sm:$0xff]  ;;  %v32_v20 = vld [vmem:[%s331_s1] sm:$0xff] }
   0x8   :  { %55 = vmatpush.msra.mxu0 %v44_v3  ;;  %152 = vmatpush.msra.mxu2 %v44_v3  ;;  %v30_v21 = vld [vmem:[%s334_s0] sm:$0xff]  ;;  %v31_v22 = vld [vmem:[%s334_s0 + $0x8] sm:$0xff]  ;;  %v105_v23 = vld [vmem:[%s332_s3 + $0x50] sm:$0xff] }
   0x9   :  { %113 = vmatpush.msra.mxu1 %v108_v8  ;;  %167 = vmatpush.msra.mxu3 %v108_v8  ;;  %v104_v24 = vld [vmem:[%s332_s3 + $0x48] sm:$0xff]  ;;  %v103_v25 = vld [vmem:[%s332_s3 + $0x40] sm:$0xff]  ;;  %v102_v26 = vld [vmem:[%s332_s3 + $0x38] sm:$0xff] }
   0xa   :  { %56 = vmatpush.msra.mxu0 %v43_v4  ;;  %153 = vmatpush.msra.mxu2 %v43_v4  ;;  %v101_v27 = vld [vmem:[%s332_s3 + $0x30] sm:$0xff]  ;;  %v100_v28 = vld [vmem:[%s332_s3 + $0x28] sm:$0xff]  ;;  %v99_v29 = vld [vmem:[%s332_s3 + $0x20] sm:$0xff] }
   0xb   :  { %114 = vmatpush.msra.mxu1 %v107_v10  ;;  %168 = vmatpush.msra.mxu3 %v107_v10  ;;  %v98_v30 = vld [vmem:[%s332_s3 + $0x18] sm:$0xff]  ;;  %v97_v31 = vld [vmem:[%s332_s3 + $0x10] sm:$0xff]  ;;  %v96_v32 = vld [vmem:[%s332_s3 + $0x8] sm:$0xff] }
   0xc   :  { %57 = vmatpush.msra.mxu0 %v42_v7  ;;  %154 = vmatpush.msra.mxu2 %v42_v7  ;;  %v95_v33 = vld [vmem:[%s332_s3] sm:$0xff] }
   0xd   :  { %115 = vmatpush.msra.mxu1 %v106_v12  ;;  %169 = vmatpush.msra.mxu3 %v106_v12  ;;  %v181_v34 = vld [vmem:[%s333_s2] ss:$0 sm:$0xff] }
   0xe   :  { %58 = vmatpush.msra.mxu0 %v41_v9  ;;  %155 = vmatpush.msra.mxu2 %v41_v9  ;;  %v182_v57 = vld [vmem:[%s335_s4] ss:$0 sm:$0xff] }
   0xf   :  { %116 = vmatpush.msra.mxu1 %v105_v23  ;;  %170 = vmatpush.msra.mxu3 %v105_v23 }
  0x10   :  { %59 = vmatpush.msra.mxu0 %v40_v11  ;;  %156 = vmatpush.msra.mxu2 %v40_v11 }
  0x11   :  { %117 = vmatpush.msra.mxu1 %v104_v24  ;;  %171 = vmatpush.msra.mxu3 %v104_v24 }
  0x12   :  { %60 = vmatpush.msra.mxu0 %v39_v13  ;;  %157 = vmatpush.msra.mxu2 %v39_v13 }
  0x13   :  { %118 = vmatpush.msra.mxu1 %v103_v25  ;;  %172 = vmatpush.msra.mxu3 %v103_v25 }
  0x14   :  { %61 = vmatpush.msra.mxu0 %v38_v14  ;;  %158 = vmatpush.msra.mxu2 %v38_v14 }
  0x15   :  { %119 = vmatpush.msra.mxu1 %v102_v26  ;;  %173 = vmatpush.msra.mxu3 %v102_v26 }
  0x16   :  { %62 = vmatpush.msra.mxu0 %v37_v15  ;;  %159 = vmatpush.msra.mxu2 %v37_v15 }
  0x17   :  { %120 = vmatpush.msra.mxu1 %v101_v27  ;;  %174 = vmatpush.msra.mxu3 %v101_v27 }
  0x18   :  { %63 = vmatpush.msra.mxu0 %v36_v16  ;;  %160 = vmatpush.msra.mxu2 %v36_v16 }
  0x19   :  { %121 = vmatpush.msra.mxu1 %v100_v28  ;;  %175 = vmatpush.msra.mxu3 %v100_v28 }
  0x1a   :  { %64 = vmatpush.msra.mxu0 %v35_v17  ;;  %161 = vmatpush.msra.mxu2 %v35_v17 }
  0x1b   :  { %122 = vmatpush.msra.mxu1 %v99_v29  ;;  %176 = vmatpush.msra.mxu3 %v99_v29 }
  0x1c   :  { %65 = vmatpush.msra.mxu0 %v34_v18  ;;  %162 = vmatpush.msra.mxu2 %v34_v18 }
  0x1d   :  { %123 = vmatpush.msra.mxu1 %v98_v30  ;;  %177 = vmatpush.msra.mxu3 %v98_v30 }
  0x1e   :  { %66 = vmatpush.msra.mxu0 %v33_v19  ;;  %163 = vmatpush.msra.mxu2 %v33_v19 }
  0x1f   :  { %124 = vmatpush.msra.mxu1 %v97_v31  ;;  %178 = vmatpush.msra.mxu3 %v97_v31 }
  0x20   :  { %67 = vmatpush.msra.mxu0 %v32_v20  ;;  %164 = vmatpush.msra.mxu2 %v32_v20 }
  0x21   :  { %68 = vmatmul.f32.vlgmr.msra.gmra.mxu0 %v30_v21  ;;  %71 = vmatmul.f32.vlgmr.msra.gmra.mxu2 %v31_v22 }
  0x22   :  { %125 = vmatpush.msra.mxu1 %v96_v32  ;;  %179 = vmatpush.msra.mxu3 %v96_v32 }
  0x24   :  { %126 = vmatpush.msra.mxu1 %v95_v33  ;;  %180 = vmatpush.msra.mxu3 %v95_v33 }
  0x9e   :  { %v69_v35 = vpop.f32.mrf.mxu0 }
  0x9f   :  { %v70_v36 = vadd.f32 %v181_v34, %v69_v35 }
  0xa1   :  { %v79_v37 = vmul.f32 0.044715, %v70_v36  ;;  %v77_v38 = vmul.f32 0.7978846, %v70_v36  ;;  %v75_v50 = vmul.f32 0.5, %v70_v36 }
  0xa3   :  { %v81_v39 = vmul.f32 %v79_v37, %v70_v36 }
  0xa4   :  { %v72_v40 = vpop.f32.mrf.mxu2 }
  0xa5   :  { %v73_v41 = vadd.f32 %v181_v34, %v72_v40  ;;  %v83_v42 = vadd.f32 1.0, %v81_v39 }
  0xa7   :  { %v80_v43 = vmul.f32 0.044715, %v73_v41  ;;  %v85_v44 = vmul.f32 %v83_v42, %v77_v38  ;;  %v78_v46 = vmul.f32 0.7978846, %v73_v41  ;;  %v76_v54 = vmul.f32 0.5, %v73_v41 }
  0xa9   :  { %183 = vtanh.f32 %v85_v44  ;;  %v82_v45 = vmul.f32 %v80_v43, %v73_v41 }
  0xab   :  { %v84_v47 = vadd.f32 1.0, %v82_v45 }
  0xad   :  { %v86_v48 = vmul.f32 %v84_v47, %v78_v46 }
  0xaf   :  { %v184_v49 = vpop.eup %183  ;;  %185 = vtanh.f32 %v86_v48 }
  0xb0   :  { %v89_v51 = vadd.f32 1.0, %v184_v49 }
  0xb2   :  { %v91_v52 = vmul.f32 %v89_v51, %v75_v50 }
  0xb4   :  { %127 = vmatmul.f32.vlgmr.msra.gmra.mxu1 %v91_v52 }
  0xb5   :  { %v186_v53 = vpop.eup %185 }
  0xb6   :  { %v90_v55 = vadd.f32 1.0, %v186_v53 }
  0xb8   :  { %v92_v56 = vmul.f32 %v90_v55, %v76_v54 }
  0xba   :  { %130 = vmatmul.f32.vlgmr.msra.gmra.mxu3 %v92_v56 }
 0x131   :  { %v128_v58 = vpop.f32.mrf.mxu1 }
 0x132   :  { %v134_v59 = vadd.f32 %v182_v57, %v128_v58 }
 0x134   :  { %143 = vst [vmem:[%s336_s5] sm:$0xff] %v134_v59 }
 0x13d   :  { %v131_v60 = vpop.f32.mrf.mxu3 }
 0x13e   :  { %v135_v61 = vadd.f32 %v182_v57, %v131_v60 }
 0x140   :  { %144 = vst [vmem:[%s336_s5 + $0x8] sm:$0xff] %v135_v61 }

</bundles_post_ra>
